<compile_context>
chip_gen: v7x
topology: tpu7x:2x2x1
jax: 0.10.0
libtpu: 0.0.40
codegen_flags: <defaults>
</compile_context>

<pallas_src>
import functools

import jax
import jax.numpy as jnp
from jax.experimental import pallas as pl
from jax.experimental.pallas import tpu as pltpu


# ----------------------------------------------------------------------------
# Fused kernel: LSTM recurrence (unrolled) + flatten + fc1/ReLU/fc2.
# ----------------------------------------------------------------------------
def _fused_lstm_mlp_kernel(x_ref, wih_ref, whh_ref, b_ref,
                           w1_ref, b1_ref, w2_ref, b2_ref, out_ref):
    # x_ref: (T*B, F), time-major (row index = t*B + b).
    B = out_ref.shape[0]
    T = x_ref.shape[0] // B
    H = whh_ref.shape[0]

    # --- Hoisted input projection + bias: one MXU call for all timesteps. ---
    gx = (jnp.dot(x_ref[...], wih_ref[...], preferred_element_type=jnp.float32)
          + b_ref[...])                                           # (T*B, 4H)

    whh = whh_ref[...]                                            # (H, 4H), resident

    # --- Recurrence, fully unrolled (T is small & static). Only h @ W_hh is on
    #     the serial critical path; gate nonlinearities go to the EUP slot. ---
    h = jnp.zeros((B, H), jnp.float32)
    c = jnp.zeros((B, H), jnp.float32)
    hs = []
    for t in range(T):
        gates = gx[t * B:(t + 1) * B, :] + jnp.dot(
            h, whh, preferred_element_type=jnp.float32)           # (B, 4H)
        i_g = jax.nn.sigmoid(gates[:, 0 * H:1 * H])
        f_g = jax.nn.sigmoid(gates[:, 1 * H:2 * H])
        g_g = jnp.tanh(gates[:, 2 * H:3 * H])
        o_g = jax.nn.sigmoid(gates[:, 3 * H:4 * H])
        c = f_g * c + i_g * g_g
        h = o_g * jnp.tanh(c)
        hs.append(h)

    # Matches torch: out.reshape(B, -1) == [h_0 | h_1 | ... | h_{T-1}] per row.
    h_flat = jnp.concatenate(hs, axis=-1)                         # (B, T*H)

    # --- Fused MLP head: relu(h_flat @ W1 + b1) then fc2 as a lane reduction. ---
    z = jnp.dot(h_flat, w1_ref[...], preferred_element_type=jnp.float32) + b1_ref[...]
    z = jnp.maximum(z, 0.0)                                       # (B, FC)
    y = jnp.sum(z * w2_ref[...], axis=-1, keepdims=True) + b2_ref[...]   # (B, 1)
    out_ref[...] = y.astype(out_ref.dtype)


@jax.jit
def lstm_model_forward(x, params):
    """x: (B, T, F) float32. Returns (B, 1) float32."""
    B, T, F = x.shape
    # Layout plumbing only (tiny XLA ops): time-major flatten so the kernel's
    # per-step slice of the precomputed input projection is contiguous rows.
    x_tm = jnp.transpose(x, (1, 0, 2)).reshape(T * B, F)

    vmem_specs = [pl.BlockSpec(memory_space=pltpu.MemorySpace.VMEM) for _ in range(8)]
    return pl.pallas_call(
        _fused_lstm_mlp_kernel,
        out_shape=jax.ShapeDtypeStruct((B, 1), jnp.float32),
        in_specs=vmem_specs,
        out_specs=pl.BlockSpec(memory_space=pltpu.MemorySpace.VMEM),
    )(x_tm, params["w_ih"], params["w_hh"], params["b_lstm"],
      params["w1"], params["b1"], params["w2"], params["b2"])


# ----------------------------------------------------------------------------
# Parameter init (mirrors PyTorch default uniform init) and pure-JAX reference.
# ----------------------------------------------------------------------------
def init_params(key, timesteps, n_features, lstm_size=64, fc_size=64):
    ks = jax.random.split(key, 8)
    k_l = 1.0 / jnp.sqrt(lstm_size)
    k_f1 = 1.0 / jnp.sqrt(timesteps * lstm_size)
    k_f2 = 1.0 / jnp.sqrt(fc_size)
    u = lambda k, shape, s: jax.random.uniform(k, shape, jnp.float32, -s, s)
    # LSTM weights pre-transposed to (in, 4H); biases b_ih + b_hh combined.
    w_ih = u(ks[0], (n_features, 4 * lstm_size), k_l)
    w_hh = u(ks[1], (lstm_size, 4 * lstm_size), k_l)
    b_lstm = u(ks[2], (1, 4 * lstm_size), k_l) + u(ks[3], (1, 4 * lstm_size), k_l)
    w1 = u(ks[4], (timesteps * lstm_size, fc_size), k_f1)
    b1 = u(ks[5], (1, fc_size), k_f1)
    w2 = u(ks[6], (1, fc_size), k_f2)          # fc2 weight stored as a row
    b2 = u(ks[7], (1, 1), k_f2)
    return dict(w_ih=w_ih, w_hh=w_hh, b_lstm=b_lstm, w1=w1, b1=b1, w2=w2, b2=b2)


def reference_forward(x, p):
    B, T, F = x.shape
    H = p["w_hh"].shape[0]
    h = jnp.zeros((B, H), jnp.float32)
    c = jnp.zeros((B, H), jnp.float32)
    outs = []
    for t in range(T):
        g = x[:, t, :] @ p["w_ih"] + h @ p["w_hh"] + p["b_lstm"]
        i = jax.nn.sigmoid(g[:, 0 * H:1 * H])
        f = jax.nn.sigmoid(g[:, 1 * H:2 * H])
        gg = jnp.tanh(g[:, 2 * H:3 * H])
        o = jax.nn.sigmoid(g[:, 3 * H:4 * H])
        c = f * c + i * gg
        h = o * jnp.tanh(c)
        outs.append(h)
    h_flat = jnp.stack(outs, axis=1).reshape(B, -1)
    z = jnp.maximum(h_flat @ p["w1"] + p["b1"], 0.0)
    return z @ p["w2"].T + p["b2"]


if __name__ == "__main__":
    B, T, F = 2, 8, 16          # batch, timesteps, n_features
    LSTM_SIZE, FC_SIZE = 64, 64

    key = jax.random.PRNGKey(0)
    k_x, k_p = jax.random.split(key)
    x = jax.random.normal(k_x, (B, T, F), jnp.float32)
    params = init_params(k_p, T, F, LSTM_SIZE, FC_SIZE)

    out = jax.block_until_ready(lstm_model_forward(x, params))
    ref = reference_forward(x, params)

    assert out.shape == (B, 1), out.shape
    assert jnp.allclose(out, ref, atol=1e-4, rtol=1e-4), (out, ref)

    print("KERNEL_OK")
</pallas_src>

<mosaic_0001>
module attributes {stable_mosaic.version = 11 : i64} {
  func.func @_fused_lstm_mlp_kernel(%arg0: memref<16x16xf32, #tpu.memory_space<vmem>>, %arg1: memref<16x256xf32, #tpu.memory_space<vmem>>, %arg2: memref<64x256xf32, #tpu.memory_space<vmem>>, %arg3: memref<1x256xf32, #tpu.memory_space<vmem>>, %arg4: memref<512x64xf32, #tpu.memory_space<vmem>>, %arg5: memref<1x64xf32, #tpu.memory_space<vmem>>, %arg6: memref<1x64xf32, #tpu.memory_space<vmem>>, %arg7: memref<1x1xf32, #tpu.memory_space<vmem>>, %arg8: memref<2x1xf32, #tpu.memory_space<vmem>>) attributes {dimension_semantics = [], scalar_prefetch = 0 : i64, scratch_operands = 0 : i64, tpu.core_type = #tpu.core_type<tc>} {
    %c0 = arith.constant 0 : index
    %c0_0 = arith.constant 0 : index
    %0 = vector.load %arg0[%c0, %c0_0] : memref<16x16xf32, #tpu.memory_space<vmem>>, vector<16x16xf32>
    %c0_1 = arith.constant 0 : index
    %c0_2 = arith.constant 0 : index
    %1 = vector.load %arg1[%c0_1, %c0_2] : memref<16x256xf32, #tpu.memory_space<vmem>>, vector<16x256xf32>
    %cst = arith.constant dense<0.000000e+00> : vector<16x256xf32>
    %2 = tpu.matmul %0, %1, %cst {dimension_numbers = #tpu.dot_dimension_numbers<[1], [0], [0], [1], [0, 0, 1, 1], [], []>} : vector<16x16xf32>, vector<16x256xf32>, vector<16x256xf32> -> vector<16x256xf32>
    %c0_3 = arith.constant 0 : index
    %c0_4 = arith.constant 0 : index
    %3 = vector.load %arg3[%c0_3, %c0_4] : memref<1x256xf32, #tpu.memory_space<vmem>>, vector<1x256xf32>
    %4 = vector.broadcast %3 : vector<1x256xf32> to vector<16x256xf32>
    %5 = arith.addf %2, %4 : vector<16x256xf32>
    %c0_5 = arith.constant 0 : index
    %c0_6 = arith.constant 0 : index
    %6 = vector.load %arg2[%c0_5, %c0_6] : memref<64x256xf32, #tpu.memory_space<vmem>>, vector<64x256xf32>
    %cst_7 = arith.constant 0.000000e+00 : f32
    %7 = vector.broadcast %cst_7 : f32 to vector<2x64xf32>
    %cst_8 = arith.constant 0.000000e+00 : f32
    %8 = vector.broadcast %cst_8 : f32 to vector<2x64xf32>
    %9 = vector.extract_strided_slice %5 {offsets = [0, 0], sizes = [2, 256], strides = [1, 1]} : vector<16x256xf32> to vector<2x256xf32>
    %cst_9 = arith.constant dense<0.000000e+00> : vector<2x256xf32>
    %10 = tpu.matmul %7, %6, %cst_9 {dimension_numbers = #tpu.dot_dimension_numbers<[1], [0], [0], [1], [0, 0, 1, 1], [], []>} : vector<2x64xf32>, vector<64x256xf32>, vector<2x256xf32> -> vector<2x256xf32>
    %11 = arith.addf %9, %10 : vector<2x256xf32>
    %12 = vector.extract_strided_slice %11 {offsets = [0, 0], sizes = [2, 64], strides = [1, 1]} : vector<2x256xf32> to vector<2x64xf32>
    %13 = arith.negf %12 : vector<2x64xf32>
    %14 = math.exp %13 : vector<2x64xf32>
    %cst_10 = arith.constant 1.000000e+00 : f32
    %15 = vector.broadcast %cst_10 : f32 to vector<2x64xf32>
    %16 = arith.addf %15, %14 : vector<2x64xf32>
    %17 = arith.divf %15, %16 : vector<2x64xf32>
    %18 = vector.extract_strided_slice %11 {offsets = [0, 64], sizes = [2, 64], strides = [1, 1]} : vector<2x256xf32> to vector<2x64xf32>
    %19 = arith.negf %18 : vector<2x64xf32>
    %20 = math.exp %19 : vector<2x64xf32>
    %cst_11 = arith.constant 1.000000e+00 : f32
    %21 = vector.broadcast %cst_11 : f32 to vector<2x64xf32>
    %22 = arith.addf %21, %20 : vector<2x64xf32>
    %23 = arith.divf %21, %22 : vector<2x64xf32>
    %24 = vector.extract_strided_slice %11 {offsets = [0, 128], sizes = [2, 64], strides = [1, 1]} : vector<2x256xf32> to vector<2x64xf32>
    %25 = math.tanh %24 : vector<2x64xf32>
    %26 = vector.extract_strided_slice %11 {offsets = [0, 192], sizes = [2, 64], strides = [1, 1]} : vector<2x256xf32> to vector<2x64xf32>
    %27 = arith.negf %26 : vector<2x64xf32>
    %28 = math.exp %27 : vector<2x64xf32>
    %cst_12 = arith.constant 1.000000e+00 : f32
    %29 = vector.broadcast %cst_12 : f32 to vector<2x64xf32>
    %30 = arith.addf %29, %28 : vector<2x64xf32>
    %31 = arith.divf %29, %30 : vector<2x64xf32>
    %32 = arith.mulf %23, %8 : vector<2x64xf32>
    %33 = arith.mulf %17, %25 : vector<2x64xf32>
    %34 = arith.addf %32, %33 : vector<2x64xf32>
    %35 = math.tanh %34 : vector<2x64xf32>
    %36 = arith.mulf %31, %35 : vector<2x64xf32>
    %37 = vector.extract_strided_slice %5 {offsets = [2, 0], sizes = [2, 256], strides = [1, 1]} : vector<16x256xf32> to vector<2x256xf32>
    %cst_13 = arith.constant dense<0.000000e+00> : vector<2x256xf32>
    %38 = tpu.matmul %36, %6, %cst_13 {dimension_numbers = #tpu.dot_dimension_numbers<[1], [0], [0], [1], [0, 0, 1, 1], [], []>} : vector<2x64xf32>, vector<64x256xf32>, vector<2x256xf32> -> vector<2x256xf32>
    %39 = arith.addf %37, %38 : vector<2x256xf32>
    %40 = vector.extract_strided_slice %39 {offsets = [0, 0], sizes = [2, 64], strides = [1, 1]} : vector<2x256xf32> to vector<2x64xf32>
    %41 = arith.negf %40 : vector<2x64xf32>
    %42 = math.exp %41 : vector<2x64xf32>
    %cst_14 = arith.constant 1.000000e+00 : f32
    %43 = vector.broadcast %cst_14 : f32 to vector<2x64xf32>
    %44 = arith.addf %43, %42 : vector<2x64xf32>
    %45 = arith.divf %43, %44 : vector<2x64xf32>
    %46 = vector.extract_strided_slice %39 {offsets = [0, 64], sizes = [2, 64], strides = [1, 1]} : vector<2x256xf32> to vector<2x64xf32>
    %47 = arith.negf %46 : vector<2x64xf32>
    %48 = math.exp %47 : vector<2x64xf32>
    %cst_15 = arith.constant 1.000000e+00 : f32
    %49 = vector.broadcast %cst_15 : f32 to vector<2x64xf32>
    %50 = arith.addf %49, %48 : vector<2x64xf32>
    %51 = arith.divf %49, %50 : vector<2x64xf32>
    %52 = vector.extract_strided_slice %39 {offsets = [0, 128], sizes = [2, 64], strides = [1, 1]} : vector<2x256xf32> to vector<2x64xf32>
    %53 = math.tanh %52 : vector<2x64xf32>
    %54 = vector.extract_strided_slice %39 {offsets = [0, 192], sizes = [2, 64], strides = [1, 1]} : vector<2x256xf32> to vector<2x64xf32>
    %55 = arith.negf %54 : vector<2x64xf32>
    %56 = math.exp %55 : vector<2x64xf32>
    %cst_16 = arith.constant 1.000000e+00 : f32
    %57 = vector.broadcast %cst_16 : f32 to vector<2x64xf32>
    %58 = arith.addf %57, %56 : vector<2x64xf32>
    %59 = arith.divf %57, %58 : vector<2x64xf32>
    %60 = arith.mulf %51, %34 : vector<2x64xf32>
    %61 = arith.mulf %45, %53 : vector<2x64xf32>
    %62 = arith.addf %60, %61 : vector<2x64xf32>
    %63 = math.tanh %62 : vector<2x64xf32>
    %64 = arith.mulf %59, %63 : vector<2x64xf32>
    %65 = vector.extract_strided_slice %5 {offsets = [4, 0], sizes = [2, 256], strides = [1, 1]} : vector<16x256xf32> to vector<2x256xf32>
    %cst_17 = arith.constant dense<0.000000e+00> : vector<2x256xf32>
    %66 = tpu.matmul %64, %6, %cst_17 {dimension_numbers = #tpu.dot_dimension_numbers<[1], [0], [0], [1], [0, 0, 1, 1], [], []>} : vector<2x64xf32>, vector<64x256xf32>, vector<2x256xf32> -> vector<2x256xf32>
    %67 = arith.addf %65, %66 : vector<2x256xf32>
    %68 = vector.extract_strided_slice %67 {offsets = [0, 0], sizes = [2, 64], strides = [1, 1]} : vector<2x256xf32> to vector<2x64xf32>
    %69 = arith.negf %68 : vector<2x64xf32>
    %70 = math.exp %69 : vector<2x64xf32>
    %cst_18 = arith.constant 1.000000e+00 : f32
    %71 = vector.broadcast %cst_18 : f32 to vector<2x64xf32>
    %72 = arith.addf %71, %70 : vector<2x64xf32>
    %73 = arith.divf %71, %72 : vector<2x64xf32>
    %74 = vector.extract_strided_slice %67 {offsets = [0, 64], sizes = [2, 64], strides = [1, 1]} : vector<2x256xf32> to vector<2x64xf32>
    %75 = arith.negf %74 : vector<2x64xf32>
    %76 = math.exp %75 : vector<2x64xf32>
    %cst_19 = arith.constant 1.000000e+00 : f32
    %77 = vector.broadcast %cst_19 : f32 to vector<2x64xf32>
    %78 = arith.addf %77, %76 : vector<2x64xf32>
    %79 = arith.divf %77, %78 : vector<2x64xf32>
    %80 = vector.extract_strided_slice %67 {offsets = [0, 128], sizes = [2, 64], strides = [1, 1]} : vector<2x256xf32> to vector<2x64xf32>
    %81 = math.tanh %80 : vector<2x64xf32>
    %82 = vector.extract_strided_slice %67 {offsets = [0, 192], sizes = [2, 64], strides = [1, 1]} : vector<2x256xf32> to vector<2x64xf32>
    %83 = arith.negf %82 : vector<2x64xf32>
    %84 = math.exp %83 : vector<2x64xf32>
    %cst_20 = arith.constant 1.000000e+00 : f32
    %85 = vector.broadcast %cst_20 : f32 to vector<2x64xf32>
    %86 = arith.addf %85, %84 : vector<2x64xf32>
    %87 = arith.divf %85, %86 : vector<2x64xf32>
    %88 = arith.mulf %79, %62 : vector<2x64xf32>
    %89 = arith.mulf %73, %81 : vector<2x64xf32>
    %90 = arith.addf %88, %89 : vector<2x64xf32>
    %91 = math.tanh %90 : vector<2x64xf32>
    %92 = arith.mulf %87, %91 : vector<2x64xf32>
    %93 = vector.extract_strided_slice %5 {offsets = [6, 0], sizes = [2, 256], strides = [1, 1]} : vector<16x256xf32> to vector<2x256xf32>
    %cst_21 = arith.constant dense<0.000000e+00> : vector<2x256xf32>
    %94 = tpu.matmul %92, %6, %cst_21 {dimension_numbers = #tpu.dot_dimension_numbers<[1], [0], [0], [1], [0, 0, 1, 1], [], []>} : vector<2x64xf32>, vector<64x256xf32>, vector<2x256xf32> -> vector<2x256xf32>
    %95 = arith.addf %93, %94 : vector<2x256xf32>
    %96 = vector.extract_strided_slice %95 {offsets = [0, 0], sizes = [2, 64], strides = [1, 1]} : vector<2x256xf32> to vector<2x64xf32>
    %97 = arith.negf %96 : vector<2x64xf32>
    %98 = math.exp %97 : vector<2x64xf32>
    %cst_22 = arith.constant 1.000000e+00 : f32
    %99 = vector.broadcast %cst_22 : f32 to vector<2x64xf32>
    %100 = arith.addf %99, %98 : vector<2x64xf32>
    %101 = arith.divf %99, %100 : vector<2x64xf32>
    %102 = vector.extract_strided_slice %95 {offsets = [0, 64], sizes = [2, 64], strides = [1, 1]} : vector<2x256xf32> to vector<2x64xf32>
    %103 = arith.negf %102 : vector<2x64xf32>
    %104 = math.exp %103 : vector<2x64xf32>
    %cst_23 = arith.constant 1.000000e+00 : f32
    %105 = vector.broadcast %cst_23 : f32 to vector<2x64xf32>
    %106 = arith.addf %105, %104 : vector<2x64xf32>
    %107 = arith.divf %105, %106 : vector<2x64xf32>
    %108 = vector.extract_strided_slice %95 {offsets = [0, 128], sizes = [2, 64], strides = [1, 1]} : vector<2x256xf32> to vector<2x64xf32>
    %109 = math.tanh %108 : vector<2x64xf32>
    %110 = vector.extract_strided_slice %95 {offsets = [0, 192], sizes = [2, 64], strides = [1, 1]} : vector<2x256xf32> to vector<2x64xf32>
    %111 = arith.negf %110 : vector<2x64xf32>
    %112 = math.exp %111 : vector<2x64xf32>
    %cst_24 = arith.constant 1.000000e+00 : f32
    %113 = vector.broadcast %cst_24 : f32 to vector<2x64xf32>
    %114 = arith.addf %113, %112 : vector<2x64xf32>
    %115 = arith.divf %113, %114 : vector<2x64xf32>
    %116 = arith.mulf %107, %90 : vector<2x64xf32>
    %117 = arith.mulf %101, %109 : vector<2x64xf32>
    %118 = arith.addf %116, %117 : vector<2x64xf32>
    %119 = math.tanh %118 : vector<2x64xf32>
    %120 = arith.mulf %115, %119 : vector<2x64xf32>
    %121 = vector.extract_strided_slice %5 {offsets = [8, 0], sizes = [2, 256], strides = [1, 1]} : vector<16x256xf32> to vector<2x256xf32>
    %cst_25 = arith.constant dense<0.000000e+00> : vector<2x256xf32>
    %122 = tpu.matmul %120, %6, %cst_25 {dimension_numbers = #tpu.dot_dimension_numbers<[1], [0], [0], [1], [0, 0, 1, 1], [], []>} : vector<2x64xf32>, vector<64x256xf32>, vector<2x256xf32> -> vector<2x256xf32>
    %123 = arith.addf %121, %122 : vector<2x256xf32>
    %124 = vector.extract_strided_slice %123 {offsets = [0, 0], sizes = [2, 64], strides = [1, 1]} : vector<2x256xf32> to vector<2x64xf32>
    %125 = arith.negf %124 : vector<2x64xf32>
    %126 = math.exp %125 : vector<2x64xf32>
    %cst_26 = arith.constant 1.000000e+00 : f32
    %127 = vector.broadcast %cst_26 : f32 to vector<2x64xf32>
    %128 = arith.addf %127, %126 : vector<2x64xf32>
    %129 = arith.divf %127, %128 : vector<2x64xf32>
    %130 = vector.extract_strided_slice %123 {offsets = [0, 64], sizes = [2, 64], strides = [1, 1]} : vector<2x256xf32> to vector<2x64xf32>
    %131 = arith.negf %130 : vector<2x64xf32>
    %132 = math.exp %131 : vector<2x64xf32>
    %cst_27 = arith.constant 1.000000e+00 : f32
    %133 = vector.broadcast %cst_27 : f32 to vector<2x64xf32>
    %134 = arith.addf %133, %132 : vector<2x64xf32>
    %135 = arith.divf %133, %134 : vector<2x64xf32>
    %136 = vector.extract_strided_slice %123 {offsets = [0, 128], sizes = [2, 64], strides = [1, 1]} : vector<2x256xf32> to vector<2x64xf32>
    %137 = math.tanh %136 : vector<2x64xf32>
    %138 = vector.extract_strided_slice %123 {offsets = [0, 192], sizes = [2, 64], strides = [1, 1]} : vector<2x256xf32> to vector<2x64xf32>
    %139 = arith.negf %138 : vector<2x64xf32>
    %140 = math.exp %139 : vector<2x64xf32>
    %cst_28 = arith.constant 1.000000e+00 : f32
    %141 = vector.broadcast %cst_28 : f32 to vector<2x64xf32>
    %142 = arith.addf %141, %140 : vector<2x64xf32>
    %143 = arith.divf %141, %142 : vector<2x64xf32>
    %144 = arith.mulf %135, %118 : vector<2x64xf32>
    %145 = arith.mulf %129, %137 : vector<2x64xf32>
    %146 = arith.addf %144, %145 : vector<2x64xf32>
    %147 = math.tanh %146 : vector<2x64xf32>
    %148 = arith.mulf %143, %147 : vector<2x64xf32>
    %149 = vector.extract_strided_slice %5 {offsets = [10, 0], sizes = [2, 256], strides = [1, 1]} : vector<16x256xf32> to vector<2x256xf32>
    %cst_29 = arith.constant dense<0.000000e+00> : vector<2x256xf32>
    %150 = tpu.matmul %148, %6, %cst_29 {dimension_numbers = #tpu.dot_dimension_numbers<[1], [0], [0], [1], [0, 0, 1, 1], [], []>} : vector<2x64xf32>, vector<64x256xf32>, vector<2x256xf32> -> vector<2x256xf32>
    %151 = arith.addf %149, %150 : vector<2x256xf32>
    %152 = vector.extract_strided_slice %151 {offsets = [0, 0], sizes = [2, 64], strides = [1, 1]} : vector<2x256xf32> to vector<2x64xf32>
    %153 = arith.negf %152 : vector<2x64xf32>
    %154 = math.exp %153 : vector<2x64xf32>
    %cst_30 = arith.constant 1.000000e+00 : f32
    %155 = vector.broadcast %cst_30 : f32 to vector<2x64xf32>
    %156 = arith.addf %155, %154 : vector<2x64xf32>
    %157 = arith.divf %155, %156 : vector<2x64xf32>
    %158 = vector.extract_strided_slice %151 {offsets = [0, 64], sizes = [2, 64], strides = [1, 1]} : vector<2x256xf32> to vector<2x64xf32>
    %159 = arith.negf %158 : vector<2x64xf32>
    %160 = math.exp %159 : vector<2x64xf32>
    %cst_31 = arith.constant 1.000000e+00 : f32
    %161 = vector.broadcast %cst_31 : f32 to vector<2x64xf32>
    %162 = arith.addf %161, %160 : vector<2x64xf32>
    %163 = arith.divf %161, %162 : vector<2x64xf32>
    %164 = vector.extract_strided_slice %151 {offsets = [0, 128], sizes = [2, 64], strides = [1, 1]} : vector<2x256xf32> to vector<2x64xf32>
    %165 = math.tanh %164 : vector<2x64xf32>
    %166 = vector.extract_strided_slice %151 {offsets = [0, 192], sizes = [2, 64], strides = [1, 1]} : vector<2x256xf32> to vector<2x64xf32>
    %167 = arith.negf %166 : vector<2x64xf32>
    %168 = math.exp %167 : vector<2x64xf32>
    %cst_32 = arith.constant 1.000000e+00 : f32
    %169 = vector.broadcast %cst_32 : f32 to vector<2x64xf32>
    %170 = arith.addf %169, %168 : vector<2x64xf32>
    %171 = arith.divf %169, %170 : vector<2x64xf32>
    %172 = arith.mulf %163, %146 : vector<2x64xf32>
    %173 = arith.mulf %157, %165 : vector<2x64xf32>
    %174 = arith.addf %172, %173 : vector<2x64xf32>
    %175 = math.tanh %174 : vector<2x64xf32>
    %176 = arith.mulf %171, %175 : vector<2x64xf32>
    %177 = vector.extract_strided_slice %5 {offsets = [12, 0], sizes = [2, 256], strides = [1, 1]} : vector<16x256xf32> to vector<2x256xf32>
    %cst_33 = arith.constant dense<0.000000e+00> : vector<2x256xf32>
    %178 = tpu.matmul %176, %6, %cst_33 {dimension_numbers = #tpu.dot_dimension_numbers<[1], [0], [0], [1], [0, 0, 1, 1], [], []>} : vector<2x64xf32>, vector<64x256xf32>, vector<2x256xf32> -> vector<2x256xf32>
    %179 = arith.addf %177, %178 : vector<2x256xf32>
    %180 = vector.extract_strided_slice %179 {offsets = [0, 0], sizes = [2, 64], strides = [1, 1]} : vector<2x256xf32> to vector<2x64xf32>
    %181 = arith.negf %180 : vector<2x64xf32>
    %182 = math.exp %181 : vector<2x64xf32>
    %cst_34 = arith.constant 1.000000e+00 : f32
    %183 = vector.broadcast %cst_34 : f32 to vector<2x64xf32>
    %184 = arith.addf %183, %182 : vector<2x64xf32>
    %185 = arith.divf %183, %184 : vector<2x64xf32>
    %186 = vector.extract_strided_slice %179 {offsets = [0, 64], sizes = [2, 64], strides = [1, 1]} : vector<2x256xf32> to vector<2x64xf32>
    %187 = arith.negf %186 : vector<2x64xf32>
    %188 = math.exp %187 : vector<2x64xf32>
    %cst_35 = arith.constant 1.000000e+00 : f32
    %189 = vector.broadcast %cst_35 : f32 to vector<2x64xf32>
    %190 = arith.addf %189, %188 : vector<2x64xf32>
    %191 = arith.divf %189, %190 : vector<2x64xf32>
    %192 = vector.extract_strided_slice %179 {offsets = [0, 128], sizes = [2, 64], strides = [1, 1]} : vector<2x256xf32> to vector<2x64xf32>
    %193 = math.tanh %192 : vector<2x64xf32>
    %194 = vector.extract_strided_slice %179 {offsets = [0, 192], sizes = [2, 64], strides = [1, 1]} : vector<2x256xf32> to vector<2x64xf32>
    %195 = arith.negf %194 : vector<2x64xf32>
    %196 = math.exp %195 : vector<2x64xf32>
    %cst_36 = arith.constant 1.000000e+00 : f32
    %197 = vector.broadcast %cst_36 : f32 to vector<2x64xf32>
    %198 = arith.addf %197, %196 : vector<2x64xf32>
    %199 = arith.divf %197, %198 : vector<2x64xf32>
    %200 = arith.mulf %191, %174 : vector<2x64xf32>
    %201 = arith.mulf %185, %193 : vector<2x64xf32>
    %202 = arith.addf %200, %201 : vector<2x64xf32>
    %203 = math.tanh %202 : vector<2x64xf32>
    %204 = arith.mulf %199, %203 : vector<2x64xf32>
    %205 = vector.extract_strided_slice %5 {offsets = [14, 0], sizes = [2, 256], strides = [1, 1]} : vector<16x256xf32> to vector<2x256xf32>
    %cst_37 = arith.constant dense<0.000000e+00> : vector<2x256xf32>
    %206 = tpu.matmul %204, %6, %cst_37 {dimension_numbers = #tpu.dot_dimension_numbers<[1], [0], [0], [1], [0, 0, 1, 1], [], []>} : vector<2x64xf32>, vector<64x256xf32>, vector<2x256xf32> -> vector<2x256xf32>
    %207 = arith.addf %205, %206 : vector<2x256xf32>
    %208 = vector.extract_strided_slice %207 {offsets = [0, 0], sizes = [2, 64], strides = [1, 1]} : vector<2x256xf32> to vector<2x64xf32>
    %209 = arith.negf %208 : vector<2x64xf32>
    %210 = math.exp %209 : vector<2x64xf32>
    %cst_38 = arith.constant 1.000000e+00 : f32
    %211 = vector.broadcast %cst_38 : f32 to vector<2x64xf32>
    %212 = arith.addf %211, %210 : vector<2x64xf32>
    %213 = arith.divf %211, %212 : vector<2x64xf32>
    %214 = vector.extract_strided_slice %207 {offsets = [0, 64], sizes = [2, 64], strides = [1, 1]} : vector<2x256xf32> to vector<2x64xf32>
    %215 = arith.negf %214 : vector<2x64xf32>
    %216 = math.exp %215 : vector<2x64xf32>
    %cst_39 = arith.constant 1.000000e+00 : f32
    %217 = vector.broadcast %cst_39 : f32 to vector<2x64xf32>
    %218 = arith.addf %217, %216 : vector<2x64xf32>
    %219 = arith.divf %217, %218 : vector<2x64xf32>
    %220 = vector.extract_strided_slice %207 {offsets = [0, 128], sizes = [2, 64], strides = [1, 1]} : vector<2x256xf32> to vector<2x64xf32>
    %221 = math.tanh %220 : vector<2x64xf32>
    %222 = vector.extract_strided_slice %207 {offsets = [0, 192], sizes = [2, 64], strides = [1, 1]} : vector<2x256xf32> to vector<2x64xf32>
    %223 = arith.negf %222 : vector<2x64xf32>
    %224 = math.exp %223 : vector<2x64xf32>
    %cst_40 = arith.constant 1.000000e+00 : f32
    %225 = vector.broadcast %cst_40 : f32 to vector<2x64xf32>
    %226 = arith.addf %225, %224 : vector<2x64xf32>
    %227 = arith.divf %225, %226 : vector<2x64xf32>
    %228 = arith.mulf %219, %202 : vector<2x64xf32>
    %229 = arith.mulf %213, %221 : vector<2x64xf32>
    %230 = arith.addf %228, %229 : vector<2x64xf32>
    %231 = math.tanh %230 : vector<2x64xf32>
    %232 = arith.mulf %227, %231 : vector<2x64xf32>
    %233 = tpu.concatenate %36, %64, %92, %120, %148, %176, %204, %232 in 1 : vector<2x64xf32>, vector<2x64xf32>, vector<2x64xf32>, vector<2x64xf32>, vector<2x64xf32>, vector<2x64xf32>, vector<2x64xf32>, vector<2x64xf32> -> vector<2x512xf32>
    %c0_41 = arith.constant 0 : index
    %c0_42 = arith.constant 0 : index
    %234 = vector.load %arg4[%c0_41, %c0_42] : memref<512x64xf32, #tpu.memory_space<vmem>>, vector<512x64xf32>
    %cst_43 = arith.constant dense<0.000000e+00> : vector<2x64xf32>
    %235 = tpu.matmul %233, %234, %cst_43 {dimension_numbers = #tpu.dot_dimension_numbers<[1], [0], [0], [1], [0, 0, 1, 1], [], []>} : vector<2x512xf32>, vector<512x64xf32>, vector<2x64xf32> -> vector<2x64xf32>
    %c0_44 = arith.constant 0 : index
    %c0_45 = arith.constant 0 : index
    %236 = vector.load %arg5[%c0_44, %c0_45] : memref<1x64xf32, #tpu.memory_space<vmem>>, vector<1x64xf32>
    %237 = vector.broadcast %236 : vector<1x64xf32> to vector<2x64xf32>
    %238 = arith.addf %235, %237 : vector<2x64xf32>
    %cst_46 = arith.constant 0.000000e+00 : f32
    %239 = vector.broadcast %cst_46 : f32 to vector<2x64xf32>
    %240 = arith.maximumf %238, %239 : vector<2x64xf32>
    %c0_47 = arith.constant 0 : index
    %c0_48 = arith.constant 0 : index
    %241 = vector.load %arg6[%c0_47, %c0_48] : memref<1x64xf32, #tpu.memory_space<vmem>>, vector<1x64xf32>
    %242 = vector.broadcast %241 : vector<1x64xf32> to vector<2x64xf32>
    %243 = arith.mulf %240, %242 : vector<2x64xf32>
    %cst_49 = arith.constant dense<0.000000e+00> : vector<2xf32>
    %244 = vector.multi_reduction <add>, %243, %cst_49 [1] : vector<2x64xf32> to vector<2xf32>
    %245 = vector.shape_cast %244 : vector<2xf32> to vector<2x1xf32>
    %c0_50 = arith.constant 0 : index
    %c0_51 = arith.constant 0 : index
    %246 = vector.load %arg7[%c0_50, %c0_51] : memref<1x1xf32, #tpu.memory_space<vmem>>, vector<1x1xf32>
    %247 = vector.broadcast %246 : vector<1x1xf32> to vector<2x1xf32>
    %248 = arith.addf %245, %247 : vector<2x1xf32>
    %c0_52 = arith.constant 0 : index
    %c0_53 = arith.constant 0 : index
    %249 = vector.load %arg8[%c0_52, %c0_53] : memref<2x1xf32, #tpu.memory_space<vmem>>, vector<2x1xf32>
    tpu.vector_store %arg8[%c0_52, %c0_53], %248 {strides = array<i32>} : memref<2x1xf32, #tpu.memory_space<vmem>>, vector<2x1xf32>,
    return
  }
}

</mosaic_0001>

<bundles_post_ra>
// kernel: lstm_model_forward.1
= control target key start
LH: loop header
LB: loop body
LE: loop exit
PB: predicated region body
PF: predicated region fallthrough
CT: control target
= control target key end

     0   :  { %v1654_v3 = vmov 0.0   ;;  %vm49_vm0 = vcmask 130048   ;;  %v39_v32 = vlaneseq  ;;  %vm149_vm1 = vcmask 523264   ;;  %s2179_s2 = inlined_call_operand.vmem [shape: f32[64,256], index: 2, kind: input, shape index: {}]   ;;  %s2180_s1 = inlined_call_operand.vmem [shape: f32[16,256], index: 1, kind: input, shape index: {}]   ;;  %s2181_s0 = inlined_call_operand.vmem [shape: f32[16,16], index: 0, kind: input, shape index: {}]   ;;  %s2182_s3 = inlined_call_operand.vmem [shape: f32[1,256], index: 3, kind: input, shape index: {}]   ;;  %s2183_s4 = inlined_call_operand.vmem [shape: f32[512,64], index: 4, kind: input, shape index: {}]   ;;  %s2184_s7 = inlined_call_operand.<no memory space> [shape: f32[1,1], index: 7, kind: input, shape index: {}]   ;;  %s2185_s5 = inlined_call_operand.vmem [shape: f32[1,64], index: 5, kind: input, shape index: {}]   ;;  %s2186_s6 = inlined_call_operand.vmem [shape: f32[1,64], index: 6, kind: input, shape index: {}]   ;;  %s2187_s8 = inlined_call_operand.vmem [shape: f32[2,1], index: 8, kind: output, shape index: {}]  }
   0x1   :  { %v134_v0 = vld [vmem:[%s2179_s2 + $0x8] sm:$0xff]  ;;  %v136_v1 = vld [vmem:[%s2179_s2 + $0x18] sm:$0xff]  ;;  %v133_v2 = vld [vmem:[%s2179_s2] sm:$0xff]  ;;  %120 = vmatprep.mubr.f32.mxu0 %v1654_v3  ;;  %217 = vmatprep.mubr.f32.mxu1 %v1654_v3  ;;  %vm1244_vm2 = vcmask 517120   ;;  %vm1256_vm3 = vcmask 1024  }
   0x2   :  { %v1712_v4 = vpack.c.bf16 %v136_v1, %v134_v0  ;;  %v135_v5 = vld [vmem:[%s2179_s2 + $0x10] sm:$0xff]  ;;  %v138_v6 = vld [vmem:[%s2179_s2 + $0x28] sm:$0xff]  ;;  %v140_v7 = vld [vmem:[%s2179_s2 + $0x38] sm:$0xff]  ;;  %v40_v33 = vshrl.u32 %v39_v32, 7 }
   0x3   :  { %v1723_v8 = vpack.c.bf16 %v135_v5, %v133_v2  ;;  %v1725_v9 = vpack.c.bf16 %v140_v7, %v138_v6  ;;  %v137_v10 = vld [vmem:[%s2179_s2 + $0x20] sm:$0xff]  ;;  %v139_v11 = vld [vmem:[%s2179_s2 + $0x30] sm:$0xff]  ;;  %v142_v12 = vld [vmem:[%s2179_s2 + $0x48] sm:$0xff] }
   0x4   :  { %1365 = vmatprep.subr.bf16.mxu1 %v1712_v4  ;;  %v144_v13 = vld [vmem:[%s2179_s2 + $0x58] sm:$0xff]  ;;  %v34_v14 = vld [vmem:[%s2180_s1 + $0x8] sm:$0xff]  ;;  %v1747_v16 = vpack.c.bf16 %v139_v11, %v137_v10  ;;  %v33_v18 = vld [vmem:[%s2180_s1] sm:$0xff]  ;;  %v41_v34 = vsub.s32 0, %v40_v33  ;;  %v45_v41 = vsub.s32 1, %v40_v33 }
   0x5   :  { %v36_v15 = vld [vmem:[%s2180_s1 + $0x18] sm:$0xff]  ;;  %1367 = vmatpush1.bf16.msra.mxu1 %v1723_v8  ;;  %v1753_v19 = vpack.c.bf16 %v144_v13, %v142_v12  ;;  %v141_v20 = vld [vmem:[%s2179_s2 + $0x40] sm:$0xff]  ;;  %v143_v21 = vld [vmem:[%s2179_s2 + $0x50] sm:$0xff] }
   0x6   :  { %v1360_v17 = vpack.c.bf16 %v36_v15, %v34_v14  ;;  %1369 = vmatprep.subr.bf16.mxu1 %v1725_v9  ;;  %v35_v22 = vld [vmem:[%s2180_s1 + $0x10] sm:$0xff]  ;;  %v146_v24 = vld [vmem:[%s2179_s2 + $0x68] sm:$0xff]  ;;  %v148_v25 = vld [vmem:[%s2179_s2 + $0x78] sm:$0xff]  ;;  %v1771_v26 = vpack.c.bf16 %v143_v21, %v141_v20 }
   0x7   :  { %v1362_v23 = vpack.c.bf16 %v35_v22, %v33_v18  ;;  %v31_v27 = vld [vmem:[%s2181_s0] sm:$0xff]  ;;  %v1777_v28 = vpack.c.bf16 %v148_v25, %v146_v24  ;;  %v147_v30 = vld [vmem:[%s2179_s2 + $0x70] sm:$0xff]  ;;  %v32_v53 = vld [vmem:[%s2181_s0 + $0x8] sm:$0xff] }
   0x8   :  { %1361 = vmatprep.subr.bf16.mxu0 %v1360_v17  ;;  %v145_v29 = vld [vmem:[%s2179_s2 + $0x60] sm:$0xff] }
   0x9   :  { %1371 = vmatpush1.bf16.msra.mxu1 %v1747_v16  ;;  %1363 = vmatpush1.bf16.msra.mxu0 %v1362_v23  ;;  %v1788_v31 = vpack.c.bf16 %v147_v30, %v145_v29  ;;  %v37_v35 = vld [vmem:[%s2182_s3] sm:$0x3]  ;;  %s1655_s3 = smov 64  }
   0xa   :  { %1373 = vmatprep.subr.bf16.mxu1 %v1753_v19  ;;  %1381 = vmatprep.subr.bf16.mxu0 %v1712_v4  ;;  %v1815_v37 = vrot.slane %v37_v35, %v41_v34  ;;  %v1821_v45 = vrot.slane %v37_v35, %v45_v41 }
   0xc   :  { %1262 = vmatmul.mubr.msk.f32.vlgmr.msra.gmra.mrb[0].mxu0 %vm49_vm0, %v31_v27 }
   0xd   :  { %1375 = vmatpush1.bf16.msra.mxu1 %v1771_v26  ;;  %1383 = vmatpush1.bf16.msra.mxu0 %v1723_v8 }
   0xe   :  { %1377 = vmatprep.subr.bf16.mxu1 %v1777_v28  ;;  %1385 = vmatprep.subr.bf16.mxu0 %v1725_v9 }
   0xf   :  { %126 = vmatprep.mubr.f32.mxu0 %v1654_v3 }
  0x10   :  { %1263 = vmatmul.mubr.msk.f32.gmra.mrb[2].mxu0 %vm49_vm0, %v32_v53 }
  0x11   :  { %1379 = vmatpush1.bf16.msra.mxu1 %v1788_v31  ;;  %1387 = vmatpush1.bf16.msra.mxu0 %v1747_v16 }
  0x12   :  { %1389 = vmatprep.subr.bf16.mxu0 %v1753_v19  ;;  %1397 = vmatprep.subr.bf16.mxu1 %v1712_v4 }
  0x13   :  { %317 = vmatprep.mubr.f32.mxu0 %v1654_v3 }
  0x14   :  { %218 = vmatmul.mubr.f32.vlgmr.msra.gmra.mrb[0].mxu1 %v1654_v3 }
  0x15   :  { %1391 = vmatpush1.bf16.msra.mxu0 %v1771_v26  ;;  %1399 = vmatpush1.bf16.msra.mxu1 %v1723_v8 }
  0x16   :  { %1393 = vmatprep.subr.bf16.mxu0 %v1777_v28  ;;  %1401 = vmatprep.subr.bf16.mxu1 %v1725_v9 }
  0x17   :  { %427 = vmatprep.mubr.f32.mxu1 %v1654_v3 }
  0x19   :  { %1395 = vmatpush1.bf16.msra.mxu0 %v1788_v31  ;;  %1403 = vmatpush1.bf16.msra.mxu1 %v1747_v16 }
  0x1a   :  { %1405 = vmatprep.subr.bf16.mxu1 %v1753_v19  ;;  %1413 = vmatprep.subr.bf16.mxu0 %v1712_v4 }
  0x1d   :  { %1407 = vmatpush1.bf16.msra.mxu1 %v1771_v26 }
  0x1e   :  { %1409 = vmatprep.subr.bf16.mxu1 %v1777_v28 }
  0x21   :  { %1411 = vmatpush1.bf16.msra.mxu1 %v1788_v31 }
  0x22   :  { %1429 = vmatprep.subr.bf16.mxu1 %v1712_v4 }
  0xdf   :  { %v122_v36 = vpop.f32.mrb[0].mxu0 }
  0xe0   :  { %v124_v38 = vpop.f32.mrb[1].mxu0  ;;  %v1818_v39 = vadd.f32 %v122_v36, %v1815_v37 }
  0xe1   :  { %v1824_v46 = vadd.f32 %v124_v38, %v1821_v45 }
  0xe3   :  { %v1834_v63 = vpop.f32.mrb[2].mxu0 }
  0xe4   :  { %v1836_v0 = vpop.f32.mrb[3].mxu0 }
  0xe7   :  { %v219_v40 = vpop.f32.mrb[0].mxu1 }
  0xe8   :  { %v224_v42 = vadd.f32 %v219_v40, %v1818_v39  ;;  %v221_v43 = vpop.f32.mrb[1].mxu1 }
  0xe9   :  { %v225_v47 = vadd.f32 %v221_v43, %v1824_v46 }
  0xea   :  { %v1264_v44 = vmul.f32 -1.442695, %v224_v42 }
  0xeb   :  { %v1265_v54 = vmul.f32 -1.442695, %v225_v47 }
  0xec   :  { %1558 = vpow2.f32 %v1264_v44 }
  0xed   :  { %1560 = vtanh.f32 %v225_v47 }
  0xf6   :  { %v1559_v48 = vpop.eup %1558 }
  0xf7   :  { %v229_v49 = vadd.f32 1.0, %v1559_v48  ;;  %v1561_v50 = vpop.eup %1560 }
  0xf9   :  { %1562 = vrcp.f32 %v229_v49 }
  0xfa   :  { %1564 = vpow2.f32 %v1265_v54 }
 0x103   :  { %v1563_v51 = vpop.eup %1562 }
 0x104   :  { %v240_v52 = vmul.f32 %v1563_v51, %v1561_v50  ;;  %v1565_v55 = vpop.eup %1564  ;;  %v239_v57 = vmul.f32 0.0, %v1563_v51 }
 0x105   :  { %v236_v56 = vadd.f32 1.0, %v1565_v55 }
 0x106   :  { %242 = vrot.lane.b32.xlu0 %v240_v52, %s1655_s3 }
 0x107   :  { %1566 = vrcp.f32 %v236_v56 }
 0x111   :  { %v1567_v60 = vpop.eup %1566 }
 0x178   :  { %v243_v58 = vpop.permute.xlu0 %242 }
 0x179   :  { %v245_v59 = vadd.f32 %v243_v58, %v239_v57 }
 0x17b   :  { %1568 = vtanh.f32 %v245_v59  ;;  %v346_v17 = vrot.slane %v245_v59, 6 }
 0x185   :  { %v1569_v61 = vpop.eup %1568 }
 0x186   :  { %v247_v62 = vmul.f32 %v1569_v61, %v1567_v60 }
 0x188   :  { %249 = vrot.lane.b32.xlu0 %v247_v62, %s1655_s3 }
 0x1fa   :  { %v1838_v1 = vpop.permute.xlu0 %249 }
 0x1fb   :  { %1266 = vmatmul.mubr.msk.f32.vlgmr.msra.gmra.mrb[4].mxu0 %vm149_vm1, %v1838_v1 }
 0x1fc   :  { %1415 = vmatpush1.bf16.msra.mxu0 %v1723_v8  ;;  %537 = vmatprep.mubr.f32.mxu0 %v1654_v3 }
 0x1fd   :  { %1417 = vmatprep.subr.bf16.mxu0 %v1725_v9 }
 0x200   :  { %1419 = vmatpush1.bf16.msra.mxu0 %v1747_v16 }
 0x201   :  { %1421 = vmatprep.subr.bf16.mxu0 %v1753_v19 }
 0x204   :  { %1423 = vmatpush1.bf16.msra.mxu0 %v1771_v26 }
 0x205   :  { %1425 = vmatprep.subr.bf16.mxu0 %v1777_v28 }
 0x208   :  { %1427 = vmatpush1.bf16.msra.mxu0 %v1788_v31 }
 0x209   :  { %1445 = vmatprep.subr.bf16.mxu0 %v1712_v4 }
 0x2ce   :  { %v319_v2 = vpop.f32.mrb[4].mxu0 }
 0x2cf   :  { %v326_v5 = vrot.slane %v319_v2, 6  ;;  %v321_v6 = vpop.f32.mrb[5].mxu0 }
 0x2d0   :  { %v327_v11 = vrot.slane %v321_v6, 6 }
 0x2d1   :  { %v330_v7 = vadd.f32 %v326_v5, %v1818_v39 }
 0x2d2   :  { %v331_v12 = vadd.f32 %v327_v11, %v1824_v46 }
 0x2d3   :  { %v1267_v10 = vmul.f32 -1.442695, %v330_v7 }
 0x2d4   :  { %v1268_v22 = vmul.f32 -1.442695, %v331_v12 }
 0x2d5   :  { %1570 = vpow2.f32 %v1267_v10 }
 0x2d6   :  { %1572 = vtanh.f32 %v331_v12 }
 0x2df   :  { %v1571_v13 = vpop.eup %1570 }
 0x2e0   :  { %v335_v14 = vadd.f32 1.0, %v1571_v13  ;;  %v1573_v15 = vpop.eup %1572 }
 0x2e2   :  { %1574 = vrcp.f32 %v335_v14 }
 0x2e3   :  { %1576 = vpow2.f32 %v1268_v22 }
 0x2ec   :  { %v1575_v18 = vpop.eup %1574 }
 0x2ed   :  { %v349_v20 = vmul.f32 %v1575_v18, %v1573_v15  ;;  %v348_v21 = vmul.f32 %v1575_v18, %v346_v17  ;;  %v1577_v23 = vpop.eup %1576 }
 0x2ee   :  { %v342_v24 = vadd.f32 1.0, %v1577_v23 }
 0x2ef   :  { %351 = vrot.lane.b32.xlu1 %v349_v20, %s1655_s3 }
 0x2f0   :  { %1578 = vrcp.f32 %v342_v24 }
 0x2fa   :  { %v1579_v29 = vpop.eup %1578 }
 0x361   :  { %v352_v25 = vpop.permute.xlu1 %351 }
 0x362   :  { %v354_v27 = vadd.f32 %v352_v25, %v348_v21 }
 0x364   :  { %1580 = vtanh.f32 %v354_v27  ;;  %v456_v49 = vrot.slane %v354_v27, 6 }
 0x36e   :  { %v1581_v30 = vpop.eup %1580 }
 0x36f   :  { %v1854_v32 = vmul.f32 %v1581_v30, %v1579_v29 }
 0x371   :  { %v358_v33 = vrot.slane %v1854_v32, 2 }
 0x373   :  { %359 = vrot.lane.b32.xlu1 %v358_v33, %s1655_s3 }
 0x3e5   :  { %v360_v34 = vpop.permute.xlu1 %359 }
 0x3e6   :  { %1269 = vmatmul.mubr.msk.f32.vlgmr.msra.gmra.mrb[2].mxu1 %vm149_vm1, %v360_v34  ;;  %v1907_v34 = vadd.f32 %v1834_v63, %v1815_v37 }
 0x3e7   :  { %1431 = vmatpush1.bf16.msra.mxu1 %v1723_v8  ;;  %647 = vmatprep.mubr.f32.mxu1 %v1654_v3 }
 0x3e8   :  { %1433 = vmatprep.subr.bf16.mxu1 %v1725_v9 }
 0x3eb   :  { %1435 = vmatpush1.bf16.msra.mxu1 %v1747_v16 }
 0x3ec   :  { %1437 = vmatprep.subr.bf16.mxu1 %v1753_v19 }
 0x3ef   :  { %1439 = vmatpush1.bf16.msra.mxu1 %v1771_v26 }
 0x3f0   :  { %1441 = vmatprep.subr.bf16.mxu1 %v1777_v28 }
 0x3f3   :  { %1443 = vmatpush1.bf16.msra.mxu1 %v1788_v31 }
 0x3f4   :  { %1461 = vmatprep.subr.bf16.mxu1 %v1712_v4 }
 0x4b9   :  { %v429_v35 = vpop.f32.mrb[2].mxu1 }
 0x4ba   :  { %v436_v36 = vrot.slane %v429_v35, 4  ;;  %v431_v38 = vpop.f32.mrb[3].mxu1 }
 0x4bb   :  { %v437_v42 = vrot.slane %v431_v38, 4 }
 0x4bc   :  { %v440_v40 = vadd.f32 %v436_v36, %v1818_v39 }
 0x4bd   :  { %v441_v43 = vadd.f32 %v437_v42, %v1824_v46 }
 0x4be   :  { %v1270_v41 = vmul.f32 -1.442695, %v440_v40 }
 0x4bf   :  { %v1271_v53 = vmul.f32 -1.442695, %v441_v43 }
 0x4c0   :  { %1582 = vpow2.f32 %v1270_v41  ;;  %v1912_v41 = vadd.f32 %v1836_v0, %v1821_v45 }
 0x4c1   :  { %1584 = vtanh.f32 %v441_v43 }
 0x4ca   :  { %v1583_v44 = vpop.eup %1582 }
 0x4cb   :  { %v445_v47 = vadd.f32 1.0, %v1583_v44  ;;  %v1585_v48 = vpop.eup %1584 }
 0x4cd   :  { %1586 = vrcp.f32 %v445_v47 }
 0x4ce   :  { %1588 = vpow2.f32 %v1271_v53 }
 0x4d7   :  { %v1587_v50 = vpop.eup %1586 }
 0x4d8   :  { %v459_v51 = vmul.f32 %v1587_v50, %v1585_v48  ;;  %v458_v52 = vmul.f32 %v1587_v50, %v456_v49  ;;  %v1589_v54 = vpop.eup %1588 }
 0x4d9   :  { %v452_v55 = vadd.f32 1.0, %v1589_v54 }
 0x4da   :  { %461 = vrot.lane.b32.xlu0 %v459_v51, %s1655_s3 }
 0x4db   :  { %1590 = vrcp.f32 %v452_v55 }
 0x4e5   :  { %v1591_v58 = vpop.eup %1590 }
 0x54c   :  { %v462_v56 = vpop.permute.xlu0 %461 }
 0x54d   :  { %v464_v57 = vadd.f32 %v462_v56, %v458_v52 }
 0x54f   :  { %1592 = vtanh.f32 %v464_v57  ;;  %v566_v17 = vrot.slane %v464_v57, 6 }
 0x559   :  { %v1593_v59 = vpop.eup %1592 }
 0x55a   :  { %v466_v60 = vmul.f32 %v1593_v59, %v1591_v58 }
 0x55c   :  { %v468_v61 = vrot.slane %v466_v60, 4 }
 0x55e   :  { %469 = vrot.lane.b32.xlu1 %v468_v61, %s1655_s3 }
 0x5d0   :  { %v1874_v62 = vpop.permute.xlu1 %469 }
 0x5d1   :  { %1272 = vmatmul.mubr.msk.f32.vlgmr.msra.gmra.mrb[6].mxu0 %vm149_vm1, %v1874_v62 }
 0x5d2   :  { %1447 = vmatpush1.bf16.msra.mxu0 %v1723_v8  ;;  %750 = vmatprep.mubr.f32.mxu0 %v1654_v3 }
 0x5d3   :  { %1449 = vmatprep.subr.bf16.mxu0 %v1725_v9 }
 0x5d6   :  { %1451 = vmatpush1.bf16.msra.mxu0 %v1747_v16 }
 0x5d7   :  { %1453 = vmatprep.subr.bf16.mxu0 %v1753_v19 }
 0x5da   :  { %1455 = vmatpush1.bf16.msra.mxu0 %v1771_v26 }
 0x5db   :  { %1457 = vmatprep.subr.bf16.mxu0 %v1777_v28 }
 0x5de   :  { %1459 = vmatpush1.bf16.msra.mxu0 %v1788_v31 }
 0x5df   :  { %1477 = vmatprep.subr.bf16.mxu0 %v1712_v4 }
 0x6a4   :  { %v539_v2 = vpop.f32.mrb[6].mxu0 }
 0x6a5   :  { %v546_v5 = vrot.slane %v539_v2, 2  ;;  %v541_v6 = vpop.f32.mrb[7].mxu0 }
 0x6a6   :  { %v547_v11 = vrot.slane %v541_v6, 2  ;;  %v1041_v6 = vld [vmem:[%s2183_s4 + $0x88] sm:$0xff] }
 0x6a7   :  { %v550_v7 = vadd.f32 %v546_v5, %v1818_v39 }
 0x6a8   :  { %v551_v12 = vadd.f32 %v547_v11, %v1824_v46 }
 0x6a9   :  { %v1273_v10 = vmul.f32 -1.442695, %v550_v7 }
 0x6aa   :  { %v1274_v4 = vmul.f32 -1.442695, %v551_v12 }
 0x6ab   :  { %1594 = vpow2.f32 %v1273_v10 }
 0x6ac   :  { %1596 = vtanh.f32 %v551_v12 }
 0x6b5   :  { %v1595_v13 = vpop.eup %1594 }
 0x6b6   :  { %v555_v14 = vadd.f32 1.0, %v1595_v13  ;;  %v1597_v15 = vpop.eup %1596 }
 0x6b8   :  { %1598 = vrcp.f32 %v555_v14 }
 0x6b9   :  { %1600 = vpow2.f32 %v1274_v4  ;;  %v1025_v4 = vld [vmem:[%s2183_s4 + $0x8] sm:$0xff] }
 0x6c2   :  { %v1599_v18 = vpop.eup %1598 }
 0x6c3   :  { %v569_v20 = vmul.f32 %v1599_v18, %v1597_v15  ;;  %v568_v21 = vmul.f32 %v1599_v18, %v566_v17  ;;  %v1601_v22 = vpop.eup %1600 }
 0x6c4   :  { %v562_v39 = vadd.f32 1.0, %v1601_v22  ;;  %v1042_v22 = vld [vmem:[%s2183_s4 + $0x90] sm:$0xff] }
 0x6c5   :  { %571 = vrot.lane.b32.xlu0 %v569_v20, %s1655_s3 }
 0x6c6   :  { %1602 = vrcp.f32 %v562_v39  ;;  %v1043_v39 = vld [vmem:[%s2183_s4 + $0x98] sm:$0xff] }
 0x6d0   :  { %v1603_v46 = vpop.eup %1602 }
 0x737   :  { %v572_v23 = vpop.permute.xlu0 %571 }
 0x738   :  { %v574_v24 = vadd.f32 %v572_v23, %v568_v21  ;;  %v1024_v21 = vld [vmem:[%s2183_s4] sm:$0xff] }
 0x739   :  { %v1494_v23 = vpack.c.bf16 %v1025_v4, %v1024_v21 }
 0x73a   :  { %1604 = vtanh.f32 %v574_v24  ;;  %v670_v48 = vrot.slane %v574_v24, 6  ;;  %v1496_v24 = vpack.c.bf16 %v1043_v39, %v1042_v22 }
 0x744   :  { %v1605_v25 = vpop.eup %1604 }
 0x745   :  { %v1890_v27 = vmul.f32 %v1605_v25, %v1603_v46  ;;  %v1026_v46 = vld [vmem:[%s2183_s4 + $0x10] sm:$0xff]  ;;  %v1027_v25 = vld [vmem:[%s2183_s4 + $0x18] sm:$0xff] }
 0x747   :  { %v578_v29 = vrot.slane %v1890_v27, 6  ;;  %v1046_v27 = vld [vmem:[%s2183_s4 + $0xb0] sm:$0xff] }
 0x749   :  { %579 = vrot.lane.b32.xlu1 %v578_v29, %s1655_s3 }
 0x7bb   :  { %v580_v30 = vpop.permute.xlu1 %579 }
 0x7bc   :  { %1275 = vmatmul.mubr.msk.f32.vlgmr.msra.gmra.mrb[4].mxu1 %vm149_vm1, %v580_v30 }
 0x7bd   :  { %1463 = vmatpush1.bf16.msra.mxu1 %v1723_v8  ;;  %860 = vmatprep.mubr.f32.mxu1 %v1654_v3 }
 0x7be   :  { %1465 = vmatprep.subr.bf16.mxu1 %v1725_v9 }
 0x7c1   :  { %1467 = vmatpush1.bf16.msra.mxu1 %v1747_v16 }
 0x7c2   :  { %1469 = vmatprep.subr.bf16.mxu1 %v1753_v19 }
 0x7c5   :  { %1471 = vmatpush1.bf16.msra.mxu1 %v1771_v26 }
 0x7c6   :  { %1473 = vmatprep.subr.bf16.mxu1 %v1777_v28 }
 0x7c9   :  { %1475 = vmatpush1.bf16.msra.mxu1 %v1788_v31 }
 0x88f   :  { %v649_v35 = vpop.f32.mrb[4].mxu1 }
 0x890   :  { %v654_v36 = vadd.f32 %v649_v35, %v1907_v34  ;;  %v651_v38 = vpop.f32.mrb[5].mxu1  ;;  %v1044_v35 = vld [vmem:[%s2183_s4 + $0xa0] sm:$0xff] }
 0x891   :  { %v655_v42 = vadd.f32 %v651_v38, %v1912_v41  ;;  %v1021_v38 = vsel %vm149_vm1, %v1874_v62, %v578_v29  ;;  %v1047_v62 = vld [vmem:[%s2183_s4 + $0xb8] sm:$0xff] }
 0x892   :  { %v1276_v40 = vmul.f32 -1.442695, %v654_v36  ;;  %v1045_v36 = vld [vmem:[%s2183_s4 + $0xa8] sm:$0xff] }
 0x893   :  { %v1277_v50 = vmul.f32 -1.442695, %v655_v42 }
 0x894   :  { %1606 = vpow2.f32 %v1276_v40  ;;  %v1498_v40 = vpack.c.bf16 %v1027_v25, %v1026_v46 }
 0x895   :  { %1608 = vtanh.f32 %v655_v42  ;;  %v1500_v42 = vpack.c.bf16 %v1045_v36, %v1044_v35 }
 0x89e   :  { %v1607_v43 = vpop.eup %1606 }
 0x89f   :  { %v659_v44 = vadd.f32 1.0, %v1607_v43  ;;  %v1609_v47 = vpop.eup %1608  ;;  %v1028_v43 = vld [vmem:[%s2183_s4 + $0x20] sm:$0xff] }
 0x8a1   :  { %1610 = vrcp.f32 %v659_v44  ;;  %v1029_v44 = vld [vmem:[%s2183_s4 + $0x28] sm:$0xff] }
 0x8a2   :  { %1612 = vpow2.f32 %v1277_v50  ;;  %v1502_v29 = vpack.c.bf16 %v1029_v44, %v1028_v43 }
 0x8ab   :  { %v1611_v37 = vpop.eup %1610 }
 0x8ac   :  { %v673_v63 = vmul.f32 %v1611_v37, %v1609_v47  ;;  %v672_v49 = vmul.f32 %v1611_v37, %v670_v48  ;;  %v1613_v51 = vpop.eup %1612  ;;  %v1504_v47 = vpack.c.bf16 %v1047_v62, %v1046_v27  ;;  %v1030_v48 = vld [vmem:[%s2183_s4 + $0x30] sm:$0xff]  ;;  %v1031_v37 = vld [vmem:[%s2183_s4 + $0x38] sm:$0xff]  ;;  %v1072_v27 = vld [vmem:[%s2183_s4 + $0x180] sm:$0xff] }
 0x8ad   :  { %v666_v52 = vadd.f32 1.0, %v1613_v51  ;;  %v1506_v50 = vpack.c.bf16 %v1031_v37, %v1030_v48  ;;  %v1073_v62 = vld [vmem:[%s2183_s4 + $0x188] sm:$0xff]  ;;  %v1074_v37 = vld [vmem:[%s2183_s4 + $0x190] sm:$0xff] }
 0x8ae   :  { %675 = vrot.lane.b32.xlu0 %v673_v63, %s1655_s3  ;;  %v1048_v63 = vld [vmem:[%s2183_s4 + $0xc0] sm:$0xff]  ;;  %v1057_v48 = vld [vmem:[%s2183_s4 + $0x108] sm:$0xff] }
 0x8af   :  { %1614 = vrcp.f32 %v666_v52  ;;  %v1032_v52 = vld [vmem:[%s2183_s4 + $0x40] sm:$0xff] }
 0x8b9   :  { %v1615_v0 = vpop.eup %1614 }
 0x920   :  { %v676_v53 = vpop.permute.xlu0 %675 }
 0x921   :  { %v678_v45 = vadd.f32 %v676_v53, %v672_v49  ;;  %v1049_v49 = vld [vmem:[%s2183_s4 + $0xc8] sm:$0xff] }
 0x922   :  { %v1508_v51 = vpack.c.bf16 %v1049_v49, %v1048_v63  ;;  %v1033_v53 = vld [vmem:[%s2183_s4 + $0x48] sm:$0xff]  ;;  %v1075_v63 = vld [vmem:[%s2183_s4 + $0x198] sm:$0xff] }
 0x923   :  { %1616 = vtanh.f32 %v678_v45 }
 0x92d   :  { %v1617_v54 = vpop.eup %1616 }
 0x92e   :  { %v680_v55 = vmul.f32 %v1617_v54, %v1615_v0  ;;  %v1051_v0 = vld [vmem:[%s2183_s4 + $0xd8] sm:$0xff]  ;;  %v1510_v54 = vpack.c.bf16 %v1033_v53, %v1032_v52  ;;  %v1076_v53 = vld [vmem:[%s2183_s4 + $0x1a0] sm:$0xff] }
 0x92f   :  { %v1059_v52 = vld [vmem:[%s2183_s4 + $0x118] sm:$0xff] }
 0x930   :  { %682 = vrot.lane.b32.xlu1 %v680_v55, %s1655_s3 }
 0x9a2   :  { %v1917_v56 = vpop.permute.xlu1 %682 }
 0x9a3   :  { %1278 = vmatmul.mubr.msk.f32.vlgmr.msra.gmra.mrb[8].mxu0 %vm149_vm1, %v1917_v56 }
 0x9a4   :  { %1479 = vmatpush1.bf16.msra.mxu0 %v1723_v8  ;;  %970 = vmatprep.mubr.f32.mxu0 %v1654_v3 }
 0x9a5   :  { %1481 = vmatprep.subr.bf16.mxu0 %v1725_v9 }
 0x9a8   :  { %1483 = vmatpush1.bf16.msra.mxu0 %v1747_v16 }
 0x9a9   :  { %1485 = vmatprep.subr.bf16.mxu0 %v1753_v19 }
 0x9ac   :  { %1487 = vmatpush1.bf16.msra.mxu0 %v1771_v26  ;;  %v779_v26 = vrot.slane %v678_v45, 6  ;;  %v1050_v45 = vld [vmem:[%s2183_s4 + $0xd0] sm:$0xff] }
 0x9ad   :  { %1489 = vmatprep.subr.bf16.mxu0 %v1777_v28  ;;  %v1512_v55 = vpack.c.bf16 %v1051_v0, %v1050_v45  ;;  %v1077_v45 = vld [vmem:[%s2183_s4 + $0x1a8] sm:$0xff] }
 0x9b0   :  { %1491 = vmatpush1.bf16.msra.mxu0 %v1788_v31  ;;  %v1040_v31 = vld [vmem:[%s2183_s4 + $0x80] sm:$0xff] }
 0x9b1   :  { %v1492_v7 = vpack.c.bf16 %v1041_v6, %v1040_v31  ;;  %v1020_v6 = vsel %vm149_vm1, %v1838_v1, %v358_v33 }
 0x9b3   :  { %1493 = vmatprep.subr.bf16.mxu1 %v1492_v7 }
 0xa76   :  { %v752_v57 = vpop.f32.mrb[8].mxu0 }
 0xa77   :  { %v759_v58 = vrot.slane %v752_v57, 6  ;;  %v754_v59 = vpop.f32.mrb[9].mxu0  ;;  %v1034_v57 = vld [vmem:[%s2183_s4 + $0x50] sm:$0xff] }
 0xa78   :  { %v760_v3 = vrot.slane %v754_v59, 6  ;;  %v1052_v59 = vld [vmem:[%s2183_s4 + $0xe0] sm:$0xff] }
 0xa79   :  { %v763_v60 = vadd.f32 %v759_v58, %v1907_v34  ;;  %v1035_v58 = vld [vmem:[%s2183_s4 + $0x58] sm:$0xff] }
 0xa7a   :  { %v764_v9 = vadd.f32 %v760_v3, %v1912_v41 }
 0xa7b   :  { %v1279_v8 = vmul.f32 -1.442695, %v763_v60  ;;  %v1053_v60 = vld [vmem:[%s2183_s4 + $0xe8] sm:$0xff] }
 0xa7c   :  { %v1280_v10 = vmul.f32 -1.442695, %v764_v9  ;;  %v1516_v3 = vpack.c.bf16 %v1053_v60, %v1052_v59  ;;  %v1079_v59 = vld [vmem:[%s2183_s4 + $0x1b8] sm:$0xff] }
 0xa7d   :  { %1618 = vpow2.f32 %v1279_v8  ;;  %v1514_v8 = vpack.c.bf16 %v1035_v58, %v1034_v57  ;;  %v1061_v57 = vld [vmem:[%s2183_s4 + $0x128] sm:$0xff]  ;;  %v1078_v58 = vld [vmem:[%s2183_s4 + $0x1b0] sm:$0xff] }
 0xa7e   :  { %1620 = vtanh.f32 %v764_v9  ;;  %v1036_v9 = vld [vmem:[%s2183_s4 + $0x60] sm:$0xff] }
 0xa87   :  { %v1619_v61 = vpop.eup %1618 }
 0xa88   :  { %v768_v16 = vadd.f32 1.0, %v1619_v61  ;;  %v1621_v19 = vpop.eup %1620  ;;  %v1037_v61 = vld [vmem:[%s2183_s4 + $0x68] sm:$0xff] }
 0xa8a   :  { %1622 = vrcp.f32 %v768_v16  ;;  %v1054_v16 = vld [vmem:[%s2183_s4 + $0xf0] sm:$0xff] }
 0xa8b   :  { %1624 = vpow2.f32 %v1280_v10 }
 0xa94   :  { %v1623_v2 = vpop.eup %1622 }
 0xa95   :  { %v782_v28 = vmul.f32 %v1623_v2, %v1621_v19  ;;  %v781_v5 = vmul.f32 %v1623_v2, %v779_v26  ;;  %v1625_v11 = vpop.eup %1624  ;;  %v1055_v19 = vld [vmem:[%s2183_s4 + $0xf8] sm:$0xff]  ;;  %v1518_v26 = vpack.c.bf16 %v1037_v61, %v1036_v9 }
 0xa96   :  { %v775_v12 = vadd.f32 1.0, %v1625_v11  ;;  %v1520_v2 = vpack.c.bf16 %v1055_v19, %v1054_v16 }
 0xa97   :  { %784 = vrot.lane.b32.xlu0 %v782_v28, %s1655_s3  ;;  %v1038_v28 = vld [vmem:[%s2183_s4 + $0x70] sm:$0xff] }
 0xa98   :  { %1626 = vrcp.f32 %v775_v12 }
 0xaa2   :  { %v1627_v15 = vpop.eup %1626 }
 0xb09   :  { %v785_v13 = vpop.permute.xlu0 %784 }
 0xb0a   :  { %v1938_v14 = vadd.f32 %v785_v13, %v781_v5  ;;  %v1039_v5 = vld [vmem:[%s2183_s4 + $0x78] sm:$0xff] }
 0xb0b   :  { %v1522_v31 = vpack.c.bf16 %v1039_v5, %v1038_v28 }
 0xb0c   :  { %1628 = vtanh.f32 %v1938_v14  ;;  %v889_v32 = vrot.slane %v1938_v14, 6 }
 0xb16   :  { %v1629_v17 = vpop.eup %1628 }
 0xb17   :  { %v1941_v18 = vmul.f32 %v1629_v17, %v1627_v15 }
 0xb19   :  { %v791_v20 = vrot.slane %v1941_v18, 2 }
 0xb1b   :  { %792 = vrot.lane.b32.xlu1 %v791_v20, %s1655_s3 }
 0xb8d   :  { %v793_v30 = vpop.permute.xlu1 %792 }
 0xb8e   :  { %1281 = vmatmul.mubr.msk.f32.vlgmr.msra.gmra.mrb[6].mxu1 %vm149_vm1, %v793_v30 }
 0xb8f   :  { %1495 = vmatpush3.bf16.msra.mxu1 %v1494_v23  ;;  %1159 = vmatprep.mubr.f32.mxu1 %v1021_v38 }
 0xb90   :  { %1497 = vmatprep.subr.bf16.mxu1 %v1496_v24 }
 0xb93   :  { %1499 = vmatpush3.bf16.msra.mxu1 %v1498_v40 }
 0xb94   :  { %1501 = vmatprep.subr.bf16.mxu1 %v1500_v42 }
 0xb97   :  { %1503 = vmatpush3.bf16.msra.mxu1 %v1502_v29  ;;  %v1056_v29 = vld [vmem:[%s2183_s4 + $0x100] sm:$0xff] }
 0xb98   :  { %1505 = vmatprep.subr.bf16.mxu1 %v1504_v47  ;;  %v1524_v47 = vpack.c.bf16 %v1073_v62, %v1072_v27  ;;  %v1526_v49 = vpack.c.bf16 %v1057_v48, %v1056_v29  ;;  %v1071_v27 = vld [vmem:[%s2183_s4 + $0x178] sm:$0xff] }
 0xb9a   :  { %1525 = vmatprep.subr.bf16.mxu0 %v1524_v47 }
 0xb9b   :  { %1507 = vmatpush3.bf16.msra.mxu1 %v1506_v50  ;;  %v1528_v50 = vpack.c.bf16 %v1075_v63, %v1074_v37 }
 0xb9c   :  { %1509 = vmatprep.subr.bf16.mxu1 %v1508_v51  ;;  %v1058_v51 = vld [vmem:[%s2183_s4 + $0x110] sm:$0xff] }
 0xb9d   :  { %v1530_v0 = vpack.c.bf16 %v1059_v52, %v1058_v51 }
 0xb9f   :  { %1511 = vmatpush3.bf16.msra.mxu1 %v1510_v54  ;;  %v1532_v54 = vpack.c.bf16 %v1077_v45, %v1076_v53 }
 0xba0   :  { %1513 = vmatprep.subr.bf16.mxu1 %v1512_v55  ;;  %v1060_v55 = vld [vmem:[%s2183_s4 + $0x120] sm:$0xff] }
 0xba1   :  { %v1534_v60 = vpack.c.bf16 %v1061_v57, %v1060_v55  ;;  %v1287_v55 = vld [vmem:[%s2185_s5] ss:$0 sm:$0xff] }
 0xba3   :  { %1515 = vmatpush3.bf16.msra.mxu1 %v1514_v8  ;;  %v1536_v8 = vpack.c.bf16 %v1079_v59, %v1078_v58 }
 0xba4   :  { %1517 = vmatprep.subr.bf16.mxu1 %v1516_v3 }
 0xba7   :  { %1519 = vmatpush3.bf16.msra.mxu1 %v1518_v26 }
 0xba8   :  { %1521 = vmatprep.subr.bf16.mxu1 %v1520_v2 }
 0xbab   :  { %1523 = vmatpush3.bf16.msra.mxu1 %v1522_v31  ;;  %v1062_v31 = vld [vmem:[%s2183_s4 + $0x130] sm:$0xff] }
 0xbae   :  { %1160 = vmatmul.mubr.f32.vlgmr.msra.gmra.mrb[8].mxu1 %v1020_v6  ;;  %v1063_v6 = vld [vmem:[%s2183_s4 + $0x138] sm:$0xff] }
 0xc61   :  { %v862_v7 = vpop.f32.mrb[6].mxu1 }
 0xc62   :  { %v869_v10 = vrot.slane %v862_v7, 4  ;;  %v864_v11 = vpop.f32.mrb[7].mxu1  ;;  %v1538_v7 = vpack.c.bf16 %v1063_v6, %v1062_v31 }
 0xc63   :  { %v870_v15 = vrot.slane %v864_v11, 4  ;;  %v1064_v11 = vld [vmem:[%s2183_s4 + $0x140] sm:$0xff] }
 0xc64   :  { %v873_v12 = vadd.f32 %v869_v10, %v1907_v34 }
 0xc65   :  { %v874_v17 = vadd.f32 %v870_v15, %v1912_v41 }
 0xc66   :  { %v1282_v13 = vmul.f32 -1.442695, %v873_v12  ;;  %v1065_v12 = vld [vmem:[%s2183_s4 + $0x148] sm:$0xff] }
 0xc67   :  { %v1283_v25 = vmul.f32 -1.442695, %v874_v17  ;;  %v1542_v15 = vpack.c.bf16 %v1065_v12, %v1064_v11 }
 0xc68   :  { %1630 = vpow2.f32 %v1282_v13  ;;  %v1082_v13 = vld [vmem:[%s2183_s4 + $0x1d0] sm:$0xff] }
 0xc69   :  { %1632 = vtanh.f32 %v874_v17  ;;  %v1083_v17 = vld [vmem:[%s2183_s4 + $0x1d8] sm:$0xff] }
 0xc72   :  { %v1631_v21 = vpop.eup %1630 }
 0xc73   :  { %v878_v4 = vadd.f32 1.0, %v1631_v21  ;;  %v1633_v22 = vpop.eup %1632  ;;  %v1066_v21 = vld [vmem:[%s2183_s4 + $0x150] sm:$0xff] }
 0xc75   :  { %1634 = vrcp.f32 %v878_v4  ;;  %v1067_v4 = vld [vmem:[%s2183_s4 + $0x158] sm:$0xff] }
 0xc76   :  { %1636 = vpow2.f32 %v1283_v25  ;;  %v1086_v25 = vld [vmem:[%s2183_s4 + $0x1f0] sm:$0xff] }
 0xc7f   :  { %v1635_v39 = vpop.eup %1634 }
 0xc80   :  { %v892_v1 = vmul.f32 %v1635_v39, %v1633_v22  ;;  %v891_v33 = vmul.f32 %v1635_v39, %v889_v32  ;;  %v1637_v30 = vpop.eup %1636  ;;  %v1544_v22 = vpack.c.bf16 %v1083_v17, %v1082_v13  ;;  %v1084_v32 = vld [vmem:[%s2183_s4 + $0x1e0] sm:$0xff]  ;;  %v1085_v39 = vld [vmem:[%s2183_s4 + $0x1e8] sm:$0xff] }
 0xc81   :  { %v1322_v23 = vpop.f32.mrb[8].mxu1  ;;  %v885_v35 = vadd.f32 1.0, %v1637_v30  ;;  %v1087_v30 = vld [vmem:[%s2183_s4 + $0x1f8] sm:$0xff] }
 0xc82   :  { %v1323_v24 = vpop.f32.mrb[9].mxu1  ;;  %894 = vrot.lane.b32.xlu0 %v892_v1, %s1655_s3  ;;  %v1546_v1 = vpack.c.bf16 %v1067_v4, %v1066_v21 }
 0xc83   :  { %v2050_v46 = vadd.f32 %v1323_v24, %v1322_v23  ;;  %1638 = vrcp.f32 %v885_v35  ;;  %v1068_v23 = vld [vmem:[%s2183_s4 + $0x160] sm:$0xff]  ;;  %v1069_v24 = vld [vmem:[%s2183_s4 + $0x168] sm:$0xff] }
 0xc8d   :  { %v1639_v14 = vpop.eup %1638 }
 0xcf4   :  { %v895_v36 = vpop.permute.xlu0 %894 }
 0xcf5   :  { %v2052_v38 = vadd.f32 %v895_v36, %v891_v33  ;;  %v1548_v33 = vpack.c.bf16 %v1085_v39, %v1084_v32 }
 0xcf7   :  { %1640 = vtanh.f32 %v2052_v38  ;;  %v999_v36 = vrot.slane %v2052_v38, 6 }
 0xd01   :  { %v1641_v40 = vpop.eup %1640 }
 0xd02   :  { %v899_v42 = vmul.f32 %v1641_v40, %v1639_v14  ;;  %v1550_v14 = vpack.c.bf16 %v1069_v24, %v1068_v23 }
 0xd04   :  { %v901_v43 = vrot.slane %v899_v42, 4  ;;  %v1552_v42 = vpack.c.bf16 %v1087_v30, %v1086_v25 }
 0xd06   :  { %902 = vrot.lane.b32.xlu1 %v901_v43, %s1655_s3  ;;  %v1070_v43 = vld [vmem:[%s2183_s4 + $0x170] sm:$0xff] }
 0xd07   :  { %v1554_v47 = vpack.c.bf16 %v1071_v27, %v1070_v43 }
 0xd78   :  { %v2056_v44 = vpop.permute.xlu1 %902 }
 0xd79   :  { %1284 = vmatmul.mubr.msk.f32.vlgmr.msra.gmra.mrb[10].mxu0 %vm149_vm1, %v2056_v44 }
 0xd7a   :  { %1527 = vmatpush3.bf16.msra.mxu0 %v1526_v49 }
 0xd7b   :  { %1529 = vmatprep.subr.bf16.mxu0 %v1528_v50 }
 0xd7e   :  { %1531 = vmatpush3.bf16.msra.mxu0 %v1530_v0  ;;  %v1022_v0 = vsel %vm149_vm1, %v1917_v56, %v791_v20  ;;  %v1288_v56 = vld [vmem:[%s2186_s6] ss:$0 sm:$0xff] }
 0xd7f   :  { %1533 = vmatprep.subr.bf16.mxu0 %v1532_v54  ;;  %v13_v54 = vstv %s2184_s7 }
 0xd80   :  { %14 = vst [vmem:[#allocation2] sm:$0x1] %v13_v54 }
 0xd82   :  { %1535 = vmatpush3.bf16.msra.mxu0 %v1534_v60 }
 0xd83   :  { %1537 = vmatprep.subr.bf16.mxu0 %v1536_v8 }
 0xd86   :  { %1539 = vmatpush3.bf16.msra.mxu0 %v1538_v7 }
 0xe4c   :  { %v972_v3 = vpop.f32.mrb[10].mxu0 }
 0xe4d   :  { %v979_v9 = vrot.slane %v972_v3, 2  ;;  %v974_v61 = vpop.f32.mrb[11].mxu0  ;;  %v1289_v3 = vld [vmem:[#allocation2] ss:$0 sm:$0xff] }
 0xe4e   :  { %v980_v26 = vrot.slane %v974_v61, 2 }
 0xe4f   :  { %v983_v16 = vadd.f32 %v979_v9, %v1907_v34  ;;  %v1080_v34 = vld [vmem:[%s2183_s4 + $0x1c0] sm:$0xff] }
 0xe50   :  { %v984_v2 = vadd.f32 %v980_v26, %v1912_v41  ;;  %v1081_v41 = vld [vmem:[%s2183_s4 + $0x1c8] sm:$0xff] }
 0xe51   :  { %v1285_v19 = vmul.f32 -1.442695, %v983_v16  ;;  %v1540_v10 = vpack.c.bf16 %v1081_v41, %v1080_v34 }
 0xe52   :  { %v1286_v38 = vmul.f32 -1.442695, %v984_v2 }
 0xe53   :  { %1642 = vpow2.f32 %v1285_v19  ;;  %1541 = vmatprep.subr.bf16.mxu0 %v1540_v10 }
 0xe54   :  { %1644 = vtanh.f32 %v984_v2  ;;  %1543 = vmatpush3.bf16.msra.mxu0 %v1542_v15 }
 0xe55   :  { %1545 = vmatprep.subr.bf16.mxu0 %v1544_v22 }
 0xe58   :  { %1547 = vmatpush3.bf16.msra.mxu0 %v1546_v1 }
 0xe59   :  { %1549 = vmatprep.subr.bf16.mxu0 %v1548_v33 }
 0xe5c   :  { %1551 = vmatpush3.bf16.msra.mxu0 %v1550_v14 }
 0xe5d   :  { %v1643_v28 = vpop.eup %1642  ;;  %1553 = vmatprep.subr.bf16.mxu0 %v1552_v42 }
 0xe5e   :  { %v988_v5 = vadd.f32 1.0, %v1643_v28  ;;  %v1645_v35 = vpop.eup %1644 }
 0xe60   :  { %1646 = vrcp.f32 %v988_v5  ;;  %1555 = vmatpush3.bf16.msra.mxu0 %v1554_v47 }
 0xe61   :  { %1648 = vpow2.f32 %v1286_v38 }
 0xe6a   :  { %v1647_v40 = vpop.eup %1646 }
 0xe6b   :  { %v1002_v62 = vmul.f32 %v1647_v40, %v1645_v35  ;;  %v1001_v29 = vmul.f32 %v1647_v40, %v999_v36  ;;  %v1649_v48 = vpop.eup %1648 }
 0xe6c   :  { %v995_v37 = vadd.f32 1.0, %v1649_v48 }
 0xe6d   :  { %1004 = vrot.lane.b32.xlu0 %v1002_v62, %s1655_s3 }
 0xe6e   :  { %1650 = vrcp.f32 %v995_v37 }
 0xe78   :  { %v1651_v50 = vpop.eup %1650 }
 0xedf   :  { %v1005_v63 = vpop.permute.xlu0 %1004 }
 0xee0   :  { %v1007_v49 = vadd.f32 %v1005_v63, %v1001_v29 }
 0xee2   :  { %1652 = vtanh.f32 %v1007_v49 }
 0xeec   :  { %v1653_v51 = vpop.eup %1652 }
 0xeed   :  { %v1009_v52 = vmul.f32 %v1653_v51, %v1651_v50 }
 0xeef   :  { %v1018_v53 = vrot.slane %v1009_v52, 6 }
 0xef1   :  { %v1023_v45 = vsel %vm149_vm1, %v2056_v44, %v1018_v53  ;;  %v1162_v44 = vadd.f32 %v2050_v46, %v1287_v55 }
 0xef2   :  { %1229 = vmatprep.mubr.f32.mxu0 %v1023_v45 }
 0xef3   :  { %1230 = vmatmul.mubr.f32.vlgmr.msra.gmra.mrb[12].mxu0 %v1022_v0 }
 0xfc6   :  { %v1357_v57 = vpop.f32.mrb[12].mxu0 }
 0xfc7   :  { %v1358_v58 = vpop.f32.mrb[13].mxu0 }
 0xfc8   :  { %v1359_v59 = vadd.f32 %v1358_v58, %v1357_v57 }
 0xfca   :  { %v1232_v60 = vadd.f32 %v1359_v59, %v1162_v44 }
 0xfcc   :  { %v1235_v18 = vmax.f32 %v1232_v60, 0.0 }
 0xfce   :  { %v1243_v20 = vmul.f32 %v1288_v56, %v1235_v18 }
 0xfd0   :  { %v1245_v8 = vsel %vm1244_vm2, %v1243_v20, 0.0 }
 0xfd1   :  { %1246 = vadd.xlane.f32.xlu1 %v1245_v8 }
0x105e   :  { %v1247_v9 = vpop.xlane.xlu1 %1246 }
0x105f   :  { %v1255_v61 = vadd.f32 %v1289_v3, %v1247_v9 }
0x1061   :  { %1257 = vst.msk [vmem:[%s2187_s8] sm:$0x3] %vm1256_vm3, %v1255_v61 }

</bundles_post_ra>
